<compile_context>
chip_gen: v7x
topology: tpu7x:2x2x1
jax: 0.10.0
libtpu: 0.0.40
codegen_flags: <defaults>
</compile_context>

<pallas_src>
import math

import jax
import jax.numpy as jnp
from jax.experimental import pallas as pl
from jax.experimental.pallas import tpu as pltpu


def _make_gate_kernel(matmul_dtype):
    def _gate_kernel(x_ref, w_ref, b_ref, o_ref):
        # x_ref: (TM, Cf)   w_ref: (Cf, Hf)   b_ref: (1, Hf) f32   o_ref: (TM, Hf)
        x = x_ref[...]
        if matmul_dtype is not None:
            x = x.astype(matmul_dtype)
        r = jnp.dot(x, w_ref[...], preferred_element_type=jnp.float32)
        r = r + b_ref[...]                      # bias already f32, broadcast over rows
        o_ref[...] = jax.nn.sigmoid(r).astype(o_ref.dtype)
    return _gate_kernel


def _pick_fold(hidden):
    """Lane-dense folding factor: make the output last dim a multiple of 128."""
    if hidden % 128 == 0:
        return 1
    fold = math.lcm(hidden, 128) // hidden
    return fold if fold * hidden <= 512 else 1


def make_admission_select_gate(weight, bias, *, tm_rows=4096, matmul_dtype=None):
    """Build a gate function with the folded weight/bias precomputed (hoisted).

    weight: (hidden, coverage_dim); bias: (hidden,).
    matmul_dtype: optional compute dtype for the MXU (e.g. jnp.bfloat16 on v5e).
    """
    hidden, cdim = weight.shape
    fold = _pick_fold(hidden)
    cf = fold * cdim
    hf = fold * hidden

    w_t = weight.T                                            # (cdim, hidden)
    if fold > 1:
        w_f = jnp.kron(jnp.eye(fold, dtype=w_t.dtype), w_t)   # block-diag (cf, hf)
        b_f = jnp.tile(bias.astype(jnp.float32), fold)[None, :]
    else:
        w_f = w_t
        b_f = bias.astype(jnp.float32)[None, :]
    if matmul_dtype is not None:
        w_f = w_f.astype(matmul_dtype)

    kernel = _make_gate_kernel(matmul_dtype)

    def gate_fn(coverage):
        orig_shape = coverage.shape
        assert orig_shape[-1] == cdim, "coverage last dim must equal coverage_dim"
        dtype = coverage.dtype
        itemsize = jnp.dtype(dtype).itemsize
        granule = max(8, 32 // itemsize)          # sublane rows: 8 f32 / 16 bf16 / 32 i8

        # Weight dtype for the MXU: matmul_dtype if given, else activation dtype.
        if matmul_dtype is None and w_f.dtype != dtype:
            w_use = w_f.astype(dtype)             # rare path; usually dtypes match
        else:
            w_use = w_f

        x2d = coverage.reshape(-1, cdim)
        m = x2d.shape[0]

        # Pad only to a multiple of fold (<= fold-1 rows), never to tile size.
        pad = (-m) % fold
        if pad:
            x2d = jnp.pad(x2d, ((0, pad), (0, 0)))
        mp = m + pad
        mf = mp // fold                           # folded rows
        xf = x2d.reshape(mf, cf)

        # ---- row tiling (in folded rows) ------------------------------------
        tmf = max(granule, (tm_rows // fold) // granule * granule)
        # keep each streamed block <= ~2 MiB regardless of user-passed tm_rows
        max_rows = ((2 << 20) // (max(cf, hf) * itemsize)) // granule * granule
        tmf = min(tmf, max(granule, max_rows))

        if mf <= tmf:
            if mf >= 2 * granule:
                # split into (at least) 2 blocks so v7x megacore gets both TCs
                tmf = pl.cdiv(pl.cdiv(mf, 2), granule) * granule
            else:
                tmf = mf                          # single full block (legal: full dim)
        grid = (pl.cdiv(mf, tmf),)                # ragged last block masked by Pallas

        # ---- scoped VMEM budget (double-buffered tiles + resident w/b) ------
        need = (2 * tmf * (cf + hf) * itemsize
                + 2 * cf * hf * jnp.dtype(w_use.dtype).itemsize
                + 2 * hf * 4)
        vmem_limit = int(min(need + (4 << 20), 48 << 20))   # <=48 MiB: v7x headroom

        out = pl.pallas_call(
            kernel,
            out_shape=jax.ShapeDtypeStruct((mf, hf), dtype),
            grid_spec=pltpu.PrefetchScalarGridSpec(
                num_scalar_prefetch=0,
                grid=grid,
                in_specs=[
                    pl.BlockSpec((tmf, cf), lambda i: (i, 0)),  # x tile: streams rows
                    pl.BlockSpec((cf, hf), lambda i: (0, 0)),   # weight: VMEM-resident
                    pl.BlockSpec((1, hf), lambda i: (0, 0)),    # f32 bias: resident
                ],
                out_specs=pl.BlockSpec((tmf, hf), lambda i: (i, 0)),
            ),
            compiler_params=pltpu.CompilerParams(
                dimension_semantics=("parallel",),
                vmem_limit_bytes=vmem_limit,
            ),
        )(xf, w_use, b_f)

        # Folded output is row-major identical to (mp, hidden); drop pad rows if any.
        out = out.reshape(mp, hidden)
        if pad:
            out = out[:m]
        return out.reshape(*orig_shape[:-1], hidden)

    return gate_fn


def admission_select_gate(coverage, weight, bias, **kwargs):
    """One-shot convenience wrapper (prefer the factory for repeated calls)."""
    return make_admission_select_gate(weight, bias, **kwargs)(coverage)


def init_params(key, coverage_dim, hidden_size):
    """Deterministic init matching nn.Linear + kaiming_normal_ on weight."""
    kw, kb = jax.random.split(key)
    std = (2.0 / coverage_dim) ** 0.5                       # kaiming_normal_, fan_in
    weight = std * jax.random.normal(kw, (hidden_size, coverage_dim), jnp.float32)
    bound = 1.0 / (coverage_dim ** 0.5)                     # nn.Linear default bias init
    bias = jax.random.uniform(kb, (hidden_size,), jnp.float32, -bound, bound)
    return weight, bias


if __name__ == "__main__":
    key = jax.random.PRNGKey(0)
    k_in, k_par, k_in2, k_in3, k_par2, k_in4 = jax.random.split(key, 6)

    batch, seq, coverage_dim, hidden_size = 2, 8, 32, 32
    coverage = jax.random.normal(k_in, (batch, seq, coverage_dim), jnp.float32)
    weight, bias = init_params(k_par, coverage_dim, hidden_size)

    gate_fn = make_admission_select_gate(weight, bias)      # w_f/b_f built once
    gate = gate_fn(coverage)
    jax.block_until_ready(gate)
    ref = jax.nn.sigmoid(coverage @ weight.T + bias)
    assert gate.shape == (batch, seq, hidden_size)
    assert jnp.allclose(gate, ref, atol=1e-5), "mismatch vs reference (small)"

    # Multi-block grid with a ragged final block (no wrapper pad / slice).
    cov2 = jax.random.normal(k_in2, (4, 300, coverage_dim), jnp.float32)
    gate2 = gate_fn(cov2)
    jax.block_until_ready(gate2)
    ref2 = jax.nn.sigmoid(cov2 @ weight.T + bias)
    assert gate2.shape == (4, 300, hidden_size)
    assert jnp.allclose(gate2, ref2, atol=1e-5), "mismatch vs reference (tiled)"

    # Row count not a multiple of fold -> exercises the tiny fold-pad path.
    cov3 = jax.random.normal(k_in3, (1, 7, coverage_dim), jnp.float32)
    gate3 = gate_fn(cov3)
    jax.block_until_ready(gate3)
    ref3 = jax.nn.sigmoid(cov3 @ weight.T + bias)
    assert gate3.shape == (1, 7, hidden_size)
    assert jnp.allclose(gate3, ref3, atol=1e-5), "mismatch vs reference (fold pad)"

    # Hidden size that does not divide 128 -> generalized lane-dense fold.
    cdim4, hid4 = 20, 48
    w4, b4 = init_params(k_par2, cdim4, hid4)
    cov4 = jax.random.normal(k_in4, (2, 12, cdim4), jnp.float32)
    gate4 = admission_select_gate(cov4, w4, b4)
    jax.block_until_ready(gate4)
    ref4 = jax.nn.sigmoid(cov4 @ w4.T + b4)
    assert gate4.shape == (2, 12, hid4)
    assert jnp.allclose(gate4, ref4, atol=1e-5), "mismatch vs reference (hidden=48)"

    print("KERNEL_OK")
</pallas_src>

<mosaic_0001>
module attributes {stable_mosaic.version = 11 : i64} {
  func.func @_gate_kernel(%arg0: i32, %arg1: memref<4x128xf32, #tpu.memory_space<vmem>>, %arg2: memref<128x128xf32, #tpu.memory_space<vmem>>, %arg3: memref<1x128xf32, #tpu.memory_space<vmem>>, %arg4: memref<4x128xf32, #tpu.memory_space<vmem>>) attributes {dimension_semantics = [#tpu.dimension_semantics<parallel>], iteration_bounds = array<i64: 1>, scalar_prefetch = 0 : i64, scratch_operands = 0 : i64, tpu.core_type = #tpu.core_type<tc>, window_params = [{transform_indices = @transform_0, window_bounds = array<i64: 4, 128>}, {pipeline_mode = #tpu.pipeline_mode<synchronous>, transform_indices = @transform_1, window_bounds = array<i64: 128, 128>}, {pipeline_mode = #tpu.pipeline_mode<synchronous>, transform_indices = @transform_2, window_bounds = array<i64: 1, 128>}, {transform_indices = @transform_3, window_bounds = array<i64: 4, 128>}]} {
    %c0 = arith.constant 0 : index
    %c0_0 = arith.constant 0 : index
    %0 = vector.load %arg1[%c0, %c0_0] : memref<4x128xf32, #tpu.memory_space<vmem>>, vector<4x128xf32>
    %c0_1 = arith.constant 0 : index
    %c0_2 = arith.constant 0 : index
    %1 = vector.load %arg2[%c0_1, %c0_2] : memref<128x128xf32, #tpu.memory_space<vmem>>, vector<128x128xf32>
    %cst = arith.constant dense<0.000000e+00> : vector<4x128xf32>
    %2 = tpu.matmul %0, %1, %cst {dimension_numbers = #tpu.dot_dimension_numbers<[1], [0], [0], [1], [0, 0, 1, 1], [], []>} : vector<4x128xf32>, vector<128x128xf32>, vector<4x128xf32> -> vector<4x128xf32>
    %c0_3 = arith.constant 0 : index
    %c0_4 = arith.constant 0 : index
    %3 = vector.load %arg3[%c0_3, %c0_4] : memref<1x128xf32, #tpu.memory_space<vmem>>, vector<1x128xf32>
    %4 = vector.broadcast %3 : vector<1x128xf32> to vector<4x128xf32>
    %5 = arith.addf %2, %4 : vector<4x128xf32>
    %6 = arith.negf %5 : vector<4x128xf32>
    %7 = math.exp %6 : vector<4x128xf32>
    %cst_5 = arith.constant 1.000000e+00 : f32
    %8 = vector.broadcast %cst_5 : f32 to vector<4x128xf32>
    %9 = arith.addf %8, %7 : vector<4x128xf32>
    %10 = arith.divf %8, %9 : vector<4x128xf32>
    %c0_6 = arith.constant 0 : index
    %c0_7 = arith.constant 0 : index
    %11 = vector.load %arg4[%c0_6, %c0_7] : memref<4x128xf32, #tpu.memory_space<vmem>>, vector<4x128xf32>
    tpu.vector_store %arg4[%c0_6, %c0_7], %10 {strides = array<i32>} : memref<4x128xf32, #tpu.memory_space<vmem>>, vector<4x128xf32>,
    return
  }
  func.func @transform_0(%arg0: i32) -> (i32, i32) {
    %c0_i32 = arith.constant 0 : i32
    %c0_i32_0 = arith.constant 0 : i32
    return %arg0, %c0_i32 : i32, i32
  }
  func.func @transform_1(%arg0: i32) -> (i32, i32) {
    %c0_i32 = arith.constant 0 : i32
    %c0_i32_0 = arith.constant 0 : i32
    %c0_i32_1 = arith.constant 0 : i32
    return %c0_i32, %c0_i32_0 : i32, i32
  }
  func.func @transform_2(%arg0: i32) -> (i32, i32) {
    %c0_i32 = arith.constant 0 : i32
    %c0_i32_0 = arith.constant 0 : i32
    %c0_i32_1 = arith.constant 0 : i32
    return %c0_i32, %c0_i32_0 : i32, i32
  }
  func.func @transform_3(%arg0: i32) -> (i32, i32) {
    %c0_i32 = arith.constant 0 : i32
    %c0_i32_0 = arith.constant 0 : i32
    return %arg0, %c0_i32 : i32, i32
  }
}

</mosaic_0001>

<bundles_post_ra>
// kernel: tpu_custom_call.1
= control target key start
LH: loop header
LB: loop body
LE: loop exit
PB: predicated region body
PF: predicated region fallthrough
CT: control target
= control target key end

     0   :  { %8 = vsyncpa [#allocation3], 0  ;;  %s394_s0 = inlined_call_operand.hbm [shape: f32[4,128], index: 0, kind: input, shape index: {}]   ;;  %s395_s1 = inlined_call_operand.hbm [shape: f32[128,128], index: 1, kind: input, shape index: {}]   ;;  %s396_s2 = inlined_call_operand.vmem [shape: f32[1,128], index: 2, kind: input, shape index: {}]   ;;  %s397_s3 = inlined_call_operand.hbm [shape: f32[4,128], index: 3, kind: output, shape index: {}]  }
   0x1   :  { %9 = vsyncpa [#allocation6], 0 }
   0x2   :  { %10 = vsyncpa [#allocation4], 0  ;;  %s320_s12 = smov [#allocation2]   ;;  %s321_s14 = smov [#allocation5]  }
   0x3   :  { %s17_s13 = sshll.u32 %s320_s12, 4  ;;  %s26_s15 = sshll.u32 %s321_s14, 4  ;;  %s18_s13 = int_to_ptr.vmem [resolvable:$true] %s17_s13  ;;  %s348_s15 = int_to_ptr.vmem [resolvable:$true] %s26_s15 }
   0x4   :  { %s248_s18 = scalar_lea.hbm %s394_s0, 64 }
   0x5   :  { %p249_p0 = scmp.ne.s32.totalorder %s394_s0, %s248_s18  ;;  %p252_p1 = scmp.lt.u32.totalorder %s248_s18, %s394_s0 }
   0x7   :  { %p254_p2 = pnand %p252_p1, %p249_p0 }
   0x9   :  { %257 = shalt.err (!%p254_p2)
}
   0xa   :  { %s258_s23 = scalar_lea.vmem %s18_s13, 64  ;;  %p263_p4 = scmp.lt.s32.totalorder %s18_s13, %s18_s13 }
   0xb   :  { %p259_p3 = scmp.ne.s32.totalorder %s18_s13, %s258_s23  ;;  %p264_p5 = scmp.lt.s32.totalorder %s258_s23, %s258_s23 }
   0xd   :  { %p265_p6 = por %p264_p5, %p263_p4 }
   0xf   :  { %p266_p7 = pnand %p265_p6, %p259_p3 }
  0x11   :  { %269 = shalt.err (!%p266_p7)
}
  0x12   :  { %20 = dma.hbm_to_vmem [thread:$0]  %s394_s0, 64, %s18_s13, [#allocation3]  }
  0x13   :  { %s270_s28 = scalar_lea.hbm %s395_s1, 2048 }
  0x14   :  { %p271_p8 = scmp.ne.s32.totalorder %s395_s1, %s270_s28  ;;  %p274_p9 = scmp.lt.u32.totalorder %s270_s28, %s395_s1 }
  0x16   :  { %p276_p10 = pnand %p274_p9, %p271_p8 }
  0x18   :  { %279 = shalt.err (!%p276_p10)
}
  0x19   :  { %s280_s6 = scalar_lea.vmem %s348_s15, 2048  ;;  %p285_p12 = scmp.lt.s32.totalorder %s348_s15, %s348_s15 }
  0x1a   :  { %p281_p11 = scmp.ne.s32.totalorder %s348_s15, %s280_s6  ;;  %p286_p13 = scmp.lt.s32.totalorder %s280_s6, %s280_s6 }
  0x1c   :  { %p287_p0 = por %p286_p13, %p285_p12 }
  0x1e   :  { %p288_p1 = pnand %p287_p0, %p281_p11 }
  0x20   :  { %291 = shalt.err (!%p288_p1)
}
  0x21   :  { %s322_s0 = smov 128   ;;  %s323_s7 = smov 8  }
  0x22   :  { %32 = dma.hbm_to_vmem [thread:$0]  %s395_s1, 2048, %s348_s15, [#allocation6], %s322_s0, %s322_s0, %s323_s7  }
  0x23   :  { %314 = dma.done.wait [#allocation3], 64  }
  0x24   :  { %315 = vsyncadd [#allocation3], 4294967232 }
  0x25   :  { %316 = dma.done.wait [#allocation6], 2048  }
  0x26   :  { %317 = vsyncadd [#allocation6], 4294965248  ;;  %v324_v0 = vmov 0.0|0.0   ;;  %vm325_vm0 = vmmov 0   ;;  %v326_v1 = vmov 0.0   ;;  %v42_v2 = vld [vmem:[#allocation5] sm:$0xff] }
  0x27   :  { %212 = vmatprep.subr.bf16.mxu0 %v324_v0  ;;  %209 = vmatprep.mubr.msk.f32.mxu0 %vm325_vm0, %v326_v1  ;;  %v43_v3 = vld [vmem:[#allocation5 + $0x8] sm:$0xff]  ;;  %v44_v4 = vld [vmem:[#allocation5 + $0x10] sm:$0xff]  ;;  %v45_v6 = vld [vmem:[#allocation5 + $0x18] sm:$0xff]  ;;  %s327_s11 = smov [#allocation7]  }
  0x28   :  { %v213_v5 = vpack.c.bf16 %v43_v3, %v42_v2  ;;  %v216_v7 = vpack.c.bf16 %v45_v6, %v44_v4  ;;  %v46_v8 = vld [vmem:[#allocation5 + $0x20] sm:$0xff]  ;;  %v47_v9 = vld [vmem:[#allocation5 + $0x28] sm:$0xff]  ;;  %v48_v11 = vld [vmem:[#allocation5 + $0x30] sm:$0xff]  ;;  %s148_s12 = sshll.u32 %s327_s11, 4  ;;  %s149_s12 = int_to_ptr.vmem [resolvable:$true] %s148_s12 }
  0x29   :  { %v219_v10 = vpack.c.bf16 %v47_v9, %v46_v8  ;;  %v49_v12 = vld [vmem:[#allocation5 + $0x38] sm:$0xff]  ;;  %v50_v14 = vld [vmem:[#allocation5 + $0x40] sm:$0xff]  ;;  %v51_v15 = vld [vmem:[#allocation5 + $0x48] sm:$0xff]  ;;  %s292_s13 = scalar_lea.vmem %s149_s12, 64  ;;  %p297_p3 = scmp.lt.s32.totalorder %s149_s12, %s149_s12 }
  0x2a   :  { %214 = vmatpush3.bf16.msra.mxu0 %v213_v5  ;;  %v222_v13 = vpack.c.bf16 %v49_v12, %v48_v11  ;;  %v225_v16 = vpack.c.bf16 %v51_v15, %v50_v14  ;;  %v52_v17 = vld [vmem:[#allocation5 + $0x50] sm:$0xff]  ;;  %v53_v18 = vld [vmem:[#allocation5 + $0x58] sm:$0xff]  ;;  %v54_v20 = vld [vmem:[#allocation5 + $0x60] sm:$0xff]  ;;  %p293_p2 = scmp.ne.s32.totalorder %s149_s12, %s292_s13  ;;  %p298_p4 = scmp.lt.s32.totalorder %s292_s13, %s292_s13 }
  0x2b   :  { %215 = vmatprep.subr.bf16.mxu0 %v324_v0  ;;  %v228_v19 = vpack.c.bf16 %v53_v18, %v52_v17  ;;  %v55_v21 = vld [vmem:[#allocation5 + $0x68] sm:$0xff]  ;;  %v56_v23 = vld [vmem:[#allocation5 + $0x70] sm:$0xff]  ;;  %v57_v24 = vld [vmem:[#allocation5 + $0x78] sm:$0xff] }
  0x2c   :  { %v231_v22 = vpack.c.bf16 %v55_v21, %v54_v20  ;;  %v234_v25 = vpack.c.bf16 %v57_v24, %v56_v23  ;;  %v41_v26 = vld [vmem:[#allocation2] sm:$0xf]  ;;  %p299_p5 = por %p298_p4, %p297_p3 }
  0x2d   :  { %v158_v27 = vld [vmem:[%s396_s2] ss:$0 sm:$0xff] }
  0x2e   :  { %217 = vmatpush3.bf16.msra.mxu0 %v216_v7  ;;  %p300_p6 = pnand %p299_p5, %p293_p2 }
  0x2f   :  { %218 = vmatprep.subr.bf16.mxu0 %v324_v0 }
  0x32   :  { %220 = vmatpush3.bf16.msra.mxu0 %v219_v10 }
  0x33   :  { %221 = vmatprep.subr.bf16.mxu0 %v324_v0 }
  0x36   :  { %223 = vmatpush3.bf16.msra.mxu0 %v222_v13 }
  0x37   :  { %224 = vmatprep.subr.bf16.mxu0 %v324_v0 }
  0x3a   :  { %226 = vmatpush3.bf16.msra.mxu0 %v225_v16 }
  0x3b   :  { %227 = vmatprep.subr.bf16.mxu0 %v324_v0 }
  0x3e   :  { %229 = vmatpush3.bf16.msra.mxu0 %v228_v19 }
  0x3f   :  { %230 = vmatprep.subr.bf16.mxu0 %v324_v0 }
  0x42   :  { %232 = vmatpush3.bf16.msra.mxu0 %v231_v22 }
  0x43   :  { %233 = vmatprep.subr.bf16.mxu0 %v324_v0 }
  0x46   :  { %235 = vmatpush3.bf16.msra.mxu0 %v234_v25 }
  0x49   :  { %210 = vmatmul.mubr.f32.vlgmr.msra.gmra.mrb[0].mxu0 %v41_v26 }
 0x11c   :  { %v131_v28 = vpop.f32.mrb[0].mxu0 }
 0x11d   :  { %v132_v29 = vadd.f32 %v158_v27, %v131_v28  ;;  %v211_v30 = vpop.f32.mrb[1].mxu0 }
 0x11f   :  { %v159_v31 = vmul.f32 -1.442695, %v132_v29 }
 0x121   :  { %244 = vpow2.f32 %v159_v31 }
 0x12b   :  { %v245_v32 = vpop.eup %244 }
 0x12c   :  { %v138_v33 = vadd.f32 1.0, %v245_v32 }
 0x12e   :  { %246 = vrcp.f32 %v138_v33 }
 0x138   :  { %v247_v34 = vpop.eup %246 }
 0x139   :  { %141 = vst [vmem:[#allocation7] sm:$0xf] %v247_v34 }
 0x13a   :  { %303 = shalt.err (!%p300_p6)
}
 0x13b   :  { %s304_s15 = scalar_lea.hbm %s397_s3, 64 }
 0x13c   :  { %p305_p7 = scmp.ne.s32.totalorder %s397_s3, %s304_s15  ;;  %p308_p8 = scmp.lt.u32.totalorder %s304_s15, %s397_s3 }
 0x13e   :  { %p310_p9 = pnand %p308_p8, %p305_p7 }
 0x140   :  { %313 = shalt.err (!%p310_p9)
}
 0x141   :  { %151 = dma.vmem_to_hbm [thread:$0]  %s149_s12, 64, %s397_s3, [#allocation4]  }
 0x142   :  { %318 = dma.done.wait [#allocation4], 64  }
 0x143   :  { %319 = vsyncadd [#allocation4], 4294967232 }
 0x144   :  { %155 = vsyncpa [#allocation3], 1 }
 0x145   :  { %156 = vsyncpa [#allocation6], 1 }
 0x146   :  { %157 = vsyncpa [#allocation4], 1 }

</bundles_post_ra>
